<compile_context>
chip_gen: v6e
topology: v6e:2x2x1
jax: 0.10.0
libtpu: 0.0.40
codegen_flags: <defaults>
</compile_context>

<pallas_src>
import functools

import jax
import jax.numpy as jnp
from jax.experimental import pallas as pl
from jax.experimental.pallas import tpu as pltpu

BN_EPS = 1e-5


def _round_up(x, m):
    return (x + m - 1) // m * m


def _bn_relu(h, g, b):
    # nn.BatchNorm1d training mode: batch mean, *biased* batch variance.
    # Single-pass stats: var = E[h^2] - mean^2 (clamped for fp safety).
    mean = jnp.mean(h, axis=0, keepdims=True)
    ex2 = jnp.mean(h * h, axis=0, keepdims=True)
    var = jnp.maximum(ex2 - mean * mean, 0.0)
    scale = jax.lax.rsqrt(var + BN_EPS) * g
    return jnp.maximum(h * scale + (b - mean * scale), 0.0)


def cvae_kernel(
    # data
    xl_ref,      # (B, input+label)   = [x | label]
    eps_ref,     # (B, latent+input)  = [eps_z | eps_x]
    # encoder weights
    e_w1_ref,    # (input+label, hidden)
    e_w2_ref,    # (hidden, hidden)
    e_wh_ref,    # (hidden, 2*latent)   = [W_mu | W_std]
    # decoder weights
    d_w1_ref,    # (latent+label, hidden)
    d_w2_ref,    # (hidden, hidden)
    d_wh_ref,    # (hidden, 2*input)    = [W_mu | W_std]
    # packed bias / BN-affine slab
    vec_ref,     # (14, VW)
    # output slab
    out_ref,     # (B, out_width)  [mu_z|std_z|z|mu_x|std_x|x_samples|0-pad]
    *, input_dim, hidden_dim, latent_dim, out_width,
):
    H, L, D = hidden_dim, latent_dim, input_dim

    xl = xl_ref[...]
    lab = xl[:, D:]                      # label part of [x | label]
    eps = eps_ref[...]
    eps_z = eps[:, :L]
    eps_x = eps[:, L:]

    vec = vec_ref[...]                   # (14, VW)

    # ---------------- Encoder ----------------
    h = jnp.dot(xl, e_w1_ref[...], preferred_element_type=jnp.float32) + vec[0:1, :H]
    h = _bn_relu(h, vec[1:2, :H], vec[2:3, :H])
    h = jnp.dot(h, e_w2_ref[...], preferred_element_type=jnp.float32) + vec[3:4, :H]
    h = _bn_relu(h, vec[4:5, :H], vec[5:6, :H])
    head_e = jnp.dot(h, e_wh_ref[...], preferred_element_type=jnp.float32) + vec[6:7, :2 * L]
    mu_z = head_e[:, :L]
    std_z = head_e[:, L:]

    # reparameterize: z = mu + eps * exp(std)
    z = mu_z + eps_z * jnp.exp(std_z)

    # ---------------- Decoder ----------------
    d_w1 = d_w1_ref[...]                 # (latent+label, hidden)
    h = (jnp.dot(z, d_w1[:L, :], preferred_element_type=jnp.float32)
         + jnp.dot(lab, d_w1[L:, :], preferred_element_type=jnp.float32)
         + vec[7:8, :H])                 # == Linear(concat(z, label))
    h = _bn_relu(h, vec[8:9, :H], vec[9:10, :H])
    h = jnp.dot(h, d_w2_ref[...], preferred_element_type=jnp.float32) + vec[10:11, :H]
    h = _bn_relu(h, vec[11:12, :H], vec[12:13, :H])
    head_d = jnp.dot(h, d_wh_ref[...], preferred_element_type=jnp.float32) + vec[13:14, :2 * D]
    mu_x = head_d[:, :D]
    std_x = head_d[:, D:]

    xs = mu_x + eps_x * jnp.exp(std_x)

    # One lane-dense full-width store:
    #   [mu_z | std_z | z | mu_x | std_x | x_samples | zero-pad]
    B = xl.shape[0]
    pad = out_width - (3 * L + 3 * D)
    pieces = [head_e, z, head_d, xs]          # head_e == [mu_z|std_z], head_d == [mu_x|std_x]
    if pad > 0:
        pieces.append(jnp.zeros((B, pad), jnp.float32))
    out_ref[...] = jnp.concatenate(pieces, axis=-1)


# ---------------------------------------------------------------------------
# Parameter construction (PyTorch nn.Linear default init, weights pre-
# transposed to (in, out)).
# ---------------------------------------------------------------------------
def _init_linear(key, fan_in, fan_out):
    kw, kb = jax.random.split(key)
    bound = 1.0 / jnp.sqrt(float(fan_in))
    w = jax.random.uniform(kw, (fan_in, fan_out), jnp.float32, -bound, bound)
    b = jax.random.uniform(kb, (fan_out,), jnp.float32, -bound, bound)
    return w, b


def init_cvae_params(key, input_dim, label_dim, hidden_dim, latent_dim):
    keys = jax.random.split(key, 8)
    # Encoder
    e_w1, e_b1 = _init_linear(keys[0], input_dim + label_dim, hidden_dim)
    e_w2, e_b2 = _init_linear(keys[1], hidden_dim, hidden_dim)
    e_wmu, e_bmu = _init_linear(keys[2], hidden_dim, latent_dim)
    e_wstd, e_bstd = _init_linear(keys[3], hidden_dim, latent_dim)
    # Decoder
    d_w1, d_b1 = _init_linear(keys[4], latent_dim + label_dim, hidden_dim)
    d_w2, d_b2 = _init_linear(keys[5], hidden_dim, hidden_dim)
    d_wmu, d_bmu = _init_linear(keys[6], hidden_dim, input_dim)
    d_wstd, d_bstd = _init_linear(keys[7], hidden_dim, input_dim)

    # Fused mu/std heads.
    e_wh = jnp.concatenate([e_wmu, e_wstd], axis=1)       # (hidden, 2*latent)
    d_wh = jnp.concatenate([d_wmu, d_wstd], axis=1)       # (hidden, 2*input)
    e_bh = jnp.concatenate([e_bmu, e_bstd])               # (2*latent,)
    d_bh = jnp.concatenate([d_bmu, d_bstd])               # (2*input,)

    ones = jnp.ones((hidden_dim,), jnp.float32)            # BN gamma (fresh init)
    zeros = jnp.zeros((hidden_dim,), jnp.float32)          # BN beta

    vw = max(hidden_dim, 2 * latent_dim, 2 * input_dim)

    def row(v):
        return jnp.pad(v, (0, vw - v.shape[0]))[None, :]

    # Packed slab, rows:
    #  0: e_b1  1: e_g1  2: e_bt1  3: e_b2  4: e_g2  5: e_bt2  6: e_bhead
    #  7: d_b1  8: d_g1  9: d_bt1 10: d_b2 11: d_g2 12: d_bt2 13: d_bhead
    vec = jnp.concatenate(
        [row(e_b1), row(ones), row(zeros), row(e_b2), row(ones), row(zeros), row(e_bh),
         row(d_b1), row(ones), row(zeros), row(d_b2), row(ones), row(zeros), row(d_bh)],
        axis=0,
    )

    return dict(e_w1=e_w1, e_w2=e_w2, e_wh=e_wh,
                d_w1=d_w1, d_w2=d_w2, d_wh=d_wh, vec=vec)


# ---------------------------------------------------------------------------
# Wrapper
# ---------------------------------------------------------------------------
def cvae_forward(x, label, eps_z, eps_x, params):
    B, input_dim = x.shape
    label_dim = label.shape[1]
    latent_dim = eps_z.shape[1]
    hidden_dim = params["e_w2"].shape[0]

    out_width = _round_up(3 * latent_dim + 3 * input_dim, 128)

    xl = jnp.concatenate([x, label], axis=-1)              # (B, input+label)
    eps = jnp.concatenate([eps_z, eps_x], axis=-1)          # (B, latent+input)

    inputs = [xl, eps,
              params["e_w1"], params["e_w2"], params["e_wh"],
              params["d_w1"], params["d_w2"], params["d_wh"],
              params["vec"]]

    # Advisory cost hint so XLA can overlap this very short custom call.
    flops = 2 * B * ((input_dim + label_dim) * hidden_dim
                     + hidden_dim * hidden_dim
                     + hidden_dim * 2 * latent_dim
                     + (latent_dim + label_dim) * hidden_dim
                     + hidden_dim * hidden_dim
                     + hidden_dim * 2 * input_dim)
    transcendentals = B * (latent_dim + input_dim) + 4 * hidden_dim
    bytes_accessed = 4 * (sum(int(a.size) for a in inputs) + B * out_width)

    vmem = pltpu.MemorySpace.VMEM
    kernel = functools.partial(
        cvae_kernel,
        input_dim=input_dim, hidden_dim=hidden_dim,
        latent_dim=latent_dim, out_width=out_width)

    out = pl.pallas_call(
        kernel,
        out_shape=jax.ShapeDtypeStruct((B, out_width), jnp.float32),
        in_specs=[pl.BlockSpec(memory_space=vmem) for _ in inputs],
        out_specs=pl.BlockSpec(memory_space=vmem),
        cost_estimate=pl.CostEstimate(flops=flops,
                                      transcendentals=transcendentals,
                                      bytes_accessed=bytes_accessed),
    )(*inputs)

    L, D = latent_dim, input_dim
    mu_z = out[:, 0:L]
    std_z = out[:, L:2 * L]
    z_samples = out[:, 2 * L:3 * L]
    mu_x = out[:, 3 * L:3 * L + D]
    std_x = out[:, 3 * L + D:3 * L + 2 * D]
    x_samples = out[:, 3 * L + 2 * D:3 * L + 3 * D]
    return mu_z, std_z, z_samples, mu_x, std_x, x_samples


# Pure-JAX reference (same math, no Pallas) for a correctness check.
def cvae_reference(x, label, eps_z, eps_x, params):
    H = params["e_w2"].shape[0]
    L = eps_z.shape[1]
    D = x.shape[1]
    vec = params["vec"]

    def bn(h):
        mean = h.mean(0, keepdims=True)
        var = ((h - mean) ** 2).mean(0, keepdims=True)
        return (h - mean) / jnp.sqrt(var + BN_EPS)

    xl = jnp.concatenate([x, label], -1)
    h = xl @ params["e_w1"] + vec[0, :H]
    h = jax.nn.relu(bn(h) * vec[1, :H] + vec[2, :H])
    h = h @ params["e_w2"] + vec[3, :H]
    h = jax.nn.relu(bn(h) * vec[4, :H] + vec[5, :H])
    head = h @ params["e_wh"] + vec[6, :2 * L]
    mu_z, std_z = head[:, :L], head[:, L:]
    z = mu_z + eps_z * jnp.exp(std_z)

    zl = jnp.concatenate([z, label], -1)
    h = zl @ params["d_w1"] + vec[7, :H]
    h = jax.nn.relu(bn(h) * vec[8, :H] + vec[9, :H])
    h = h @ params["d_w2"] + vec[10, :H]
    h = jax.nn.relu(bn(h) * vec[11, :H] + vec[12, :H])
    head = h @ params["d_wh"] + vec[13, :2 * D]
    mu_x, std_x = head[:, :D], head[:, D:]
    xs = mu_x + eps_x * jnp.exp(std_x)
    return mu_z, std_z, z, mu_x, std_x, xs


if __name__ == "__main__":
    B, INPUT_DIM, LABEL_DIM, HIDDEN_DIM, LATENT_DIM = 8, 16, 8, 32, 8

    key = jax.random.PRNGKey(0)
    k_param, k_x, k_lab, k_ez, k_ex = jax.random.split(key, 5)

    params = init_cvae_params(k_param, INPUT_DIM, LABEL_DIM, HIDDEN_DIM, LATENT_DIM)

    x = jax.random.normal(k_x, (B, INPUT_DIM), jnp.float32)
    label = jax.random.normal(k_lab, (B, LABEL_DIM), jnp.float32)
    # torch.randn_like equivalents (deterministic via PRNGKey(0)):
    eps_z = jax.random.normal(k_ez, (B, LATENT_DIM), jnp.float32)
    eps_x = jax.random.normal(k_ex, (B, INPUT_DIM), jnp.float32)

    outs = cvae_forward(x, label, eps_z, eps_x, params)
    outs = jax.block_until_ready(outs)

    mu_z, std_z, z_samples, mu_x, std_x, x_samples = outs
    assert mu_z.shape == (B, LATENT_DIM)
    assert std_z.shape == (B, LATENT_DIM)
    assert z_samples.shape == (B, LATENT_DIM)
    assert mu_x.shape == (B, INPUT_DIM)
    assert std_x.shape == (B, INPUT_DIM)
    assert x_samples.shape == (B, INPUT_DIM)
    assert all(bool(jnp.all(jnp.isfinite(o))) for o in outs)

    # Correctness vs. pure-JAX reference of the same module math.
    refs = cvae_reference(x, label, eps_z, eps_x, params)
    for got, want in zip(outs, refs):
        assert jnp.allclose(got, want, atol=2e-3, rtol=2e-3), (
            float(jnp.max(jnp.abs(got - want))))

    print("KERNEL_OK")
</pallas_src>

<mosaic_0001>
module attributes {stable_mosaic.version = 11 : i64} {
  func.func @cvae_kernel(%arg0: memref<8x24xf32, #tpu.memory_space<vmem>>, %arg1: memref<8x24xf32, #tpu.memory_space<vmem>>, %arg2: memref<24x32xf32, #tpu.memory_space<vmem>>, %arg3: memref<32x32xf32, #tpu.memory_space<vmem>>, %arg4: memref<32x16xf32, #tpu.memory_space<vmem>>, %arg5: memref<16x32xf32, #tpu.memory_space<vmem>>, %arg6: memref<32x32xf32, #tpu.memory_space<vmem>>, %arg7: memref<32x32xf32, #tpu.memory_space<vmem>>, %arg8: memref<14x32xf32, #tpu.memory_space<vmem>>, %arg9: memref<8x128xf32, #tpu.memory_space<vmem>>) attributes {dimension_semantics = [], scalar_prefetch = 0 : i64, scratch_operands = 0 : i64, tpu.core_type = #tpu.core_type<tc>} {
    %c0 = arith.constant 0 : index
    %c0_0 = arith.constant 0 : index
    %0 = vector.load %arg0[%c0, %c0_0] : memref<8x24xf32, #tpu.memory_space<vmem>>, vector<8x24xf32>
    %1 = vector.extract_strided_slice %0 {offsets = [0, 16], sizes = [8, 8], strides = [1, 1]} : vector<8x24xf32> to vector<8x8xf32>
    %c0_1 = arith.constant 0 : index
    %c0_2 = arith.constant 0 : index
    %2 = vector.load %arg1[%c0_1, %c0_2] : memref<8x24xf32, #tpu.memory_space<vmem>>, vector<8x24xf32>
    %3 = vector.extract_strided_slice %2 {offsets = [0, 0], sizes = [8, 8], strides = [1, 1]} : vector<8x24xf32> to vector<8x8xf32>
    %4 = vector.extract_strided_slice %2 {offsets = [0, 8], sizes = [8, 16], strides = [1, 1]} : vector<8x24xf32> to vector<8x16xf32>
    %c0_3 = arith.constant 0 : index
    %c0_4 = arith.constant 0 : index
    %5 = vector.load %arg8[%c0_3, %c0_4] : memref<14x32xf32, #tpu.memory_space<vmem>>, vector<14x32xf32>
    %c0_5 = arith.constant 0 : index
    %c0_6 = arith.constant 0 : index
    %6 = vector.load %arg2[%c0_5, %c0_6] : memref<24x32xf32, #tpu.memory_space<vmem>>, vector<24x32xf32>
    %cst = arith.constant dense<0.000000e+00> : vector<8x32xf32>
    %7 = tpu.matmul %0, %6, %cst {dimension_numbers = #tpu.dot_dimension_numbers<[1], [0], [0], [1], [0, 0, 1, 1], [], []>} : vector<8x24xf32>, vector<24x32xf32>, vector<8x32xf32> -> vector<8x32xf32>
    %8 = vector.extract_strided_slice %5 {offsets = [0, 0], sizes = [1, 32], strides = [1, 1]} : vector<14x32xf32> to vector<1x32xf32>
    %9 = vector.broadcast %8 : vector<1x32xf32> to vector<8x32xf32>
    %10 = arith.addf %7, %9 : vector<8x32xf32>
    %11 = vector.extract_strided_slice %5 {offsets = [1, 0], sizes = [1, 32], strides = [1, 1]} : vector<14x32xf32> to vector<1x32xf32>
    %12 = vector.extract_strided_slice %5 {offsets = [2, 0], sizes = [1, 32], strides = [1, 1]} : vector<14x32xf32> to vector<1x32xf32>
    %cst_7 = arith.constant dense<0.000000e+00> : vector<32xf32>
    %13 = vector.multi_reduction <add>, %10, %cst_7 [0] : vector<8x32xf32> to vector<32xf32>
    %14 = vector.shape_cast %13 : vector<32xf32> to vector<1x32xf32>
    %cst_8 = arith.constant 8.000000e+00 : f32
    %15 = vector.broadcast %cst_8 : f32 to vector<1x32xf32>
    %16 = arith.divf %14, %15 : vector<1x32xf32>
    %17 = arith.mulf %10, %10 : vector<8x32xf32>
    %cst_9 = arith.constant dense<0.000000e+00> : vector<32xf32>
    %18 = vector.multi_reduction <add>, %17, %cst_9 [0] : vector<8x32xf32> to vector<32xf32>
    %19 = vector.shape_cast %18 : vector<32xf32> to vector<1x32xf32>
    %cst_10 = arith.constant 8.000000e+00 : f32
    %20 = vector.broadcast %cst_10 : f32 to vector<1x32xf32>
    %21 = arith.divf %19, %20 : vector<1x32xf32>
    %22 = arith.mulf %16, %16 : vector<1x32xf32>
    %23 = arith.subf %21, %22 : vector<1x32xf32>
    %cst_11 = arith.constant 0.000000e+00 : f32
    %24 = vector.broadcast %cst_11 : f32 to vector<1x32xf32>
    %25 = arith.maximumf %23, %24 : vector<1x32xf32>
    %cst_12 = arith.constant 9.99999974E-6 : f32
    %26 = vector.broadcast %cst_12 : f32 to vector<1x32xf32>
    %27 = arith.addf %25, %26 : vector<1x32xf32>
    %28 = math.rsqrt %27 : vector<1x32xf32>
    %29 = arith.mulf %28, %11 : vector<1x32xf32>
    %30 = vector.broadcast %29 : vector<1x32xf32> to vector<8x32xf32>
    %31 = arith.mulf %10, %30 : vector<8x32xf32>
    %32 = arith.mulf %16, %29 : vector<1x32xf32>
    %33 = arith.subf %12, %32 : vector<1x32xf32>
    %34 = vector.broadcast %33 : vector<1x32xf32> to vector<8x32xf32>
    %35 = arith.addf %31, %34 : vector<8x32xf32>
    %cst_13 = arith.constant 0.000000e+00 : f32
    %36 = vector.broadcast %cst_13 : f32 to vector<8x32xf32>
    %37 = arith.maximumf %35, %36 : vector<8x32xf32>
    %c0_14 = arith.constant 0 : index
    %c0_15 = arith.constant 0 : index
    %38 = vector.load %arg3[%c0_14, %c0_15] : memref<32x32xf32, #tpu.memory_space<vmem>>, vector<32x32xf32>
    %cst_16 = arith.constant dense<0.000000e+00> : vector<8x32xf32>
    %39 = tpu.matmul %37, %38, %cst_16 {dimension_numbers = #tpu.dot_dimension_numbers<[1], [0], [0], [1], [0, 0, 1, 1], [], []>} : vector<8x32xf32>, vector<32x32xf32>, vector<8x32xf32> -> vector<8x32xf32>
    %40 = vector.extract_strided_slice %5 {offsets = [3, 0], sizes = [1, 32], strides = [1, 1]} : vector<14x32xf32> to vector<1x32xf32>
    %41 = vector.broadcast %40 : vector<1x32xf32> to vector<8x32xf32>
    %42 = arith.addf %39, %41 : vector<8x32xf32>
    %43 = vector.extract_strided_slice %5 {offsets = [4, 0], sizes = [1, 32], strides = [1, 1]} : vector<14x32xf32> to vector<1x32xf32>
    %44 = vector.extract_strided_slice %5 {offsets = [5, 0], sizes = [1, 32], strides = [1, 1]} : vector<14x32xf32> to vector<1x32xf32>
    %cst_17 = arith.constant dense<0.000000e+00> : vector<32xf32>
    %45 = vector.multi_reduction <add>, %42, %cst_17 [0] : vector<8x32xf32> to vector<32xf32>
    %46 = vector.shape_cast %45 : vector<32xf32> to vector<1x32xf32>
    %cst_18 = arith.constant 8.000000e+00 : f32
    %47 = vector.broadcast %cst_18 : f32 to vector<1x32xf32>
    %48 = arith.divf %46, %47 : vector<1x32xf32>
    %49 = arith.mulf %42, %42 : vector<8x32xf32>
    %cst_19 = arith.constant dense<0.000000e+00> : vector<32xf32>
    %50 = vector.multi_reduction <add>, %49, %cst_19 [0] : vector<8x32xf32> to vector<32xf32>
    %51 = vector.shape_cast %50 : vector<32xf32> to vector<1x32xf32>
    %cst_20 = arith.constant 8.000000e+00 : f32
    %52 = vector.broadcast %cst_20 : f32 to vector<1x32xf32>
    %53 = arith.divf %51, %52 : vector<1x32xf32>
    %54 = arith.mulf %48, %48 : vector<1x32xf32>
    %55 = arith.subf %53, %54 : vector<1x32xf32>
    %cst_21 = arith.constant 0.000000e+00 : f32
    %56 = vector.broadcast %cst_21 : f32 to vector<1x32xf32>
    %57 = arith.maximumf %55, %56 : vector<1x32xf32>
    %cst_22 = arith.constant 9.99999974E-6 : f32
    %58 = vector.broadcast %cst_22 : f32 to vector<1x32xf32>
    %59 = arith.addf %57, %58 : vector<1x32xf32>
    %60 = math.rsqrt %59 : vector<1x32xf32>
    %61 = arith.mulf %60, %43 : vector<1x32xf32>
    %62 = vector.broadcast %61 : vector<1x32xf32> to vector<8x32xf32>
    %63 = arith.mulf %42, %62 : vector<8x32xf32>
    %64 = arith.mulf %48, %61 : vector<1x32xf32>
    %65 = arith.subf %44, %64 : vector<1x32xf32>
    %66 = vector.broadcast %65 : vector<1x32xf32> to vector<8x32xf32>
    %67 = arith.addf %63, %66 : vector<8x32xf32>
    %cst_23 = arith.constant 0.000000e+00 : f32
    %68 = vector.broadcast %cst_23 : f32 to vector<8x32xf32>
    %69 = arith.maximumf %67, %68 : vector<8x32xf32>
    %c0_24 = arith.constant 0 : index
    %c0_25 = arith.constant 0 : index
    %70 = vector.load %arg4[%c0_24, %c0_25] : memref<32x16xf32, #tpu.memory_space<vmem>>, vector<32x16xf32>
    %cst_26 = arith.constant dense<0.000000e+00> : vector<8x16xf32>
    %71 = tpu.matmul %69, %70, %cst_26 {dimension_numbers = #tpu.dot_dimension_numbers<[1], [0], [0], [1], [0, 0, 1, 1], [], []>} : vector<8x32xf32>, vector<32x16xf32>, vector<8x16xf32> -> vector<8x16xf32>
    %72 = vector.extract_strided_slice %5 {offsets = [6, 0], sizes = [1, 16], strides = [1, 1]} : vector<14x32xf32> to vector<1x16xf32>
    %73 = vector.broadcast %72 : vector<1x16xf32> to vector<8x16xf32>
    %74 = arith.addf %71, %73 : vector<8x16xf32>
    %75 = vector.extract_strided_slice %74 {offsets = [0, 0], sizes = [8, 8], strides = [1, 1]} : vector<8x16xf32> to vector<8x8xf32>
    %76 = vector.extract_strided_slice %74 {offsets = [0, 8], sizes = [8, 8], strides = [1, 1]} : vector<8x16xf32> to vector<8x8xf32>
    %77 = math.exp %76 : vector<8x8xf32>
    %78 = arith.mulf %3, %77 : vector<8x8xf32>
    %79 = arith.addf %75, %78 : vector<8x8xf32>
    %c0_27 = arith.constant 0 : index
    %c0_28 = arith.constant 0 : index
    %80 = vector.load %arg5[%c0_27, %c0_28] : memref<16x32xf32, #tpu.memory_space<vmem>>, vector<16x32xf32>
    %81 = vector.extract_strided_slice %80 {offsets = [0, 0], sizes = [8, 32], strides = [1, 1]} : vector<16x32xf32> to vector<8x32xf32>
    %cst_29 = arith.constant dense<0.000000e+00> : vector<8x32xf32>
    %82 = tpu.matmul %79, %81, %cst_29 {dimension_numbers = #tpu.dot_dimension_numbers<[1], [0], [0], [1], [0, 0, 1, 1], [], []>} : vector<8x8xf32>, vector<8x32xf32>, vector<8x32xf32> -> vector<8x32xf32>
    %83 = vector.extract_strided_slice %80 {offsets = [8, 0], sizes = [8, 32], strides = [1, 1]} : vector<16x32xf32> to vector<8x32xf32>
    %cst_30 = arith.constant dense<0.000000e+00> : vector<8x32xf32>
    %84 = tpu.matmul %1, %83, %cst_30 {dimension_numbers = #tpu.dot_dimension_numbers<[1], [0], [0], [1], [0, 0, 1, 1], [], []>} : vector<8x8xf32>, vector<8x32xf32>, vector<8x32xf32> -> vector<8x32xf32>
    %85 = arith.addf %82, %84 : vector<8x32xf32>
    %86 = vector.extract_strided_slice %5 {offsets = [7, 0], sizes = [1, 32], strides = [1, 1]} : vector<14x32xf32> to vector<1x32xf32>
    %87 = vector.broadcast %86 : vector<1x32xf32> to vector<8x32xf32>
    %88 = arith.addf %85, %87 : vector<8x32xf32>
    %89 = vector.extract_strided_slice %5 {offsets = [8, 0], sizes = [1, 32], strides = [1, 1]} : vector<14x32xf32> to vector<1x32xf32>
    %90 = vector.extract_strided_slice %5 {offsets = [9, 0], sizes = [1, 32], strides = [1, 1]} : vector<14x32xf32> to vector<1x32xf32>
    %cst_31 = arith.constant dense<0.000000e+00> : vector<32xf32>
    %91 = vector.multi_reduction <add>, %88, %cst_31 [0] : vector<8x32xf32> to vector<32xf32>
    %92 = vector.shape_cast %91 : vector<32xf32> to vector<1x32xf32>
    %cst_32 = arith.constant 8.000000e+00 : f32
    %93 = vector.broadcast %cst_32 : f32 to vector<1x32xf32>
    %94 = arith.divf %92, %93 : vector<1x32xf32>
    %95 = arith.mulf %88, %88 : vector<8x32xf32>
    %cst_33 = arith.constant dense<0.000000e+00> : vector<32xf32>
    %96 = vector.multi_reduction <add>, %95, %cst_33 [0] : vector<8x32xf32> to vector<32xf32>
    %97 = vector.shape_cast %96 : vector<32xf32> to vector<1x32xf32>
    %cst_34 = arith.constant 8.000000e+00 : f32
    %98 = vector.broadcast %cst_34 : f32 to vector<1x32xf32>
    %99 = arith.divf %97, %98 : vector<1x32xf32>
    %100 = arith.mulf %94, %94 : vector<1x32xf32>
    %101 = arith.subf %99, %100 : vector<1x32xf32>
    %cst_35 = arith.constant 0.000000e+00 : f32
    %102 = vector.broadcast %cst_35 : f32 to vector<1x32xf32>
    %103 = arith.maximumf %101, %102 : vector<1x32xf32>
    %cst_36 = arith.constant 9.99999974E-6 : f32
    %104 = vector.broadcast %cst_36 : f32 to vector<1x32xf32>
    %105 = arith.addf %103, %104 : vector<1x32xf32>
    %106 = math.rsqrt %105 : vector<1x32xf32>
    %107 = arith.mulf %106, %89 : vector<1x32xf32>
    %108 = vector.broadcast %107 : vector<1x32xf32> to vector<8x32xf32>
    %109 = arith.mulf %88, %108 : vector<8x32xf32>
    %110 = arith.mulf %94, %107 : vector<1x32xf32>
    %111 = arith.subf %90, %110 : vector<1x32xf32>
    %112 = vector.broadcast %111 : vector<1x32xf32> to vector<8x32xf32>
    %113 = arith.addf %109, %112 : vector<8x32xf32>
    %cst_37 = arith.constant 0.000000e+00 : f32
    %114 = vector.broadcast %cst_37 : f32 to vector<8x32xf32>
    %115 = arith.maximumf %113, %114 : vector<8x32xf32>
    %c0_38 = arith.constant 0 : index
    %c0_39 = arith.constant 0 : index
    %116 = vector.load %arg6[%c0_38, %c0_39] : memref<32x32xf32, #tpu.memory_space<vmem>>, vector<32x32xf32>
    %cst_40 = arith.constant dense<0.000000e+00> : vector<8x32xf32>
    %117 = tpu.matmul %115, %116, %cst_40 {dimension_numbers = #tpu.dot_dimension_numbers<[1], [0], [0], [1], [0, 0, 1, 1], [], []>} : vector<8x32xf32>, vector<32x32xf32>, vector<8x32xf32> -> vector<8x32xf32>
    %118 = vector.extract_strided_slice %5 {offsets = [10, 0], sizes = [1, 32], strides = [1, 1]} : vector<14x32xf32> to vector<1x32xf32>
    %119 = vector.broadcast %118 : vector<1x32xf32> to vector<8x32xf32>
    %120 = arith.addf %117, %119 : vector<8x32xf32>
    %121 = vector.extract_strided_slice %5 {offsets = [11, 0], sizes = [1, 32], strides = [1, 1]} : vector<14x32xf32> to vector<1x32xf32>
    %122 = vector.extract_strided_slice %5 {offsets = [12, 0], sizes = [1, 32], strides = [1, 1]} : vector<14x32xf32> to vector<1x32xf32>
    %cst_41 = arith.constant dense<0.000000e+00> : vector<32xf32>
    %123 = vector.multi_reduction <add>, %120, %cst_41 [0] : vector<8x32xf32> to vector<32xf32>
    %124 = vector.shape_cast %123 : vector<32xf32> to vector<1x32xf32>
    %cst_42 = arith.constant 8.000000e+00 : f32
    %125 = vector.broadcast %cst_42 : f32 to vector<1x32xf32>
    %126 = arith.divf %124, %125 : vector<1x32xf32>
    %127 = arith.mulf %120, %120 : vector<8x32xf32>
    %cst_43 = arith.constant dense<0.000000e+00> : vector<32xf32>
    %128 = vector.multi_reduction <add>, %127, %cst_43 [0] : vector<8x32xf32> to vector<32xf32>
    %129 = vector.shape_cast %128 : vector<32xf32> to vector<1x32xf32>
    %cst_44 = arith.constant 8.000000e+00 : f32
    %130 = vector.broadcast %cst_44 : f32 to vector<1x32xf32>
    %131 = arith.divf %129, %130 : vector<1x32xf32>
    %132 = arith.mulf %126, %126 : vector<1x32xf32>
    %133 = arith.subf %131, %132 : vector<1x32xf32>
    %cst_45 = arith.constant 0.000000e+00 : f32
    %134 = vector.broadcast %cst_45 : f32 to vector<1x32xf32>
    %135 = arith.maximumf %133, %134 : vector<1x32xf32>
    %cst_46 = arith.constant 9.99999974E-6 : f32
    %136 = vector.broadcast %cst_46 : f32 to vector<1x32xf32>
    %137 = arith.addf %135, %136 : vector<1x32xf32>
    %138 = math.rsqrt %137 : vector<1x32xf32>
    %139 = arith.mulf %138, %121 : vector<1x32xf32>
    %140 = vector.broadcast %139 : vector<1x32xf32> to vector<8x32xf32>
    %141 = arith.mulf %120, %140 : vector<8x32xf32>
    %142 = arith.mulf %126, %139 : vector<1x32xf32>
    %143 = arith.subf %122, %142 : vector<1x32xf32>
    %144 = vector.broadcast %143 : vector<1x32xf32> to vector<8x32xf32>
    %145 = arith.addf %141, %144 : vector<8x32xf32>
    %cst_47 = arith.constant 0.000000e+00 : f32
    %146 = vector.broadcast %cst_47 : f32 to vector<8x32xf32>
    %147 = arith.maximumf %145, %146 : vector<8x32xf32>
    %c0_48 = arith.constant 0 : index
    %c0_49 = arith.constant 0 : index
    %148 = vector.load %arg7[%c0_48, %c0_49] : memref<32x32xf32, #tpu.memory_space<vmem>>, vector<32x32xf32>
    %cst_50 = arith.constant dense<0.000000e+00> : vector<8x32xf32>
    %149 = tpu.matmul %147, %148, %cst_50 {dimension_numbers = #tpu.dot_dimension_numbers<[1], [0], [0], [1], [0, 0, 1, 1], [], []>} : vector<8x32xf32>, vector<32x32xf32>, vector<8x32xf32> -> vector<8x32xf32>
    %150 = vector.extract_strided_slice %5 {offsets = [13, 0], sizes = [1, 32], strides = [1, 1]} : vector<14x32xf32> to vector<1x32xf32>
    %151 = vector.broadcast %150 : vector<1x32xf32> to vector<8x32xf32>
    %152 = arith.addf %149, %151 : vector<8x32xf32>
    %153 = vector.extract_strided_slice %152 {offsets = [0, 0], sizes = [8, 16], strides = [1, 1]} : vector<8x32xf32> to vector<8x16xf32>
    %154 = vector.extract_strided_slice %152 {offsets = [0, 16], sizes = [8, 16], strides = [1, 1]} : vector<8x32xf32> to vector<8x16xf32>
    %155 = math.exp %154 : vector<8x16xf32>
    %156 = arith.mulf %4, %155 : vector<8x16xf32>
    %157 = arith.addf %153, %156 : vector<8x16xf32>
    %cst_51 = arith.constant 0.000000e+00 : f32
    %158 = vector.broadcast %cst_51 : f32 to vector<8x56xf32>
    %159 = tpu.concatenate %74, %79, %152, %157, %158 in 1 : vector<8x16xf32>, vector<8x8xf32>, vector<8x32xf32>, vector<8x16xf32>, vector<8x56xf32> -> vector<8x128xf32>
    %c0_52 = arith.constant 0 : index
    %c0_53 = arith.constant 0 : index
    %160 = vector.load %arg9[%c0_52, %c0_53] : memref<8x128xf32, #tpu.memory_space<vmem>>, vector<8x128xf32>
    tpu.vector_store %arg9[%c0_52, %c0_53], %159 {strides = array<i32>} : memref<8x128xf32, #tpu.memory_space<vmem>>, vector<8x128xf32>,
    return
  }
}

</mosaic_0001>

<bundles_post_ra>
// kernel: tpu_custom_call.1
= control target key start
LH: loop header
LB: loop body
LE: loop exit
PB: predicated region body
PF: predicated region fallthrough
CT: control target
= control target key end

     0   :  { %14 = vsyncpa [#allocation3], 0  ;;  %s1404_s0 = inlined_call_operand.hbm [shape: f32[8,24], index: 0, kind: input, shape index: {}]   ;;  %s1405_s1 = inlined_call_operand.hbm [shape: f32[8,24], index: 1, kind: input, shape index: {}]   ;;  %s1406_s2 = inlined_call_operand.hbm [shape: f32[24,32], index: 2, kind: input, shape index: {}]   ;;  %s1407_s3 = inlined_call_operand.vmem [shape: f32[32,32], index: 3, kind: input, shape index: {}]   ;;  %s1408_s4 = inlined_call_operand.vmem [shape: f32[32,16], index: 4, kind: input, shape index: {}]   ;;  %s1409_s5 = inlined_call_operand.vmem [shape: f32[16,32], index: 5, kind: input, shape index: {}]   ;;  %s1410_s6 = inlined_call_operand.hbm [shape: f32[32,32], index: 6, kind: input, shape index: {}]   ;;  %s1411_s7 = inlined_call_operand.hbm [shape: f32[32,32], index: 7, kind: input, shape index: {}]   ;;  %s1412_s8 = inlined_call_operand.hbm [shape: f32[14,32], index: 8, kind: input, shape index: {}]   ;;  %s1413_s9 = inlined_call_operand.hbm [shape: f32[8,128], index: 9, kind: output, shape index: {}]  }
   0x1   :  { %15 = vsyncpa [#allocation6], 0 }
   0x2   :  { %16 = vsyncpa [#allocation9], 0 }
   0x3   :  { %17 = vsyncpa [#allocation12], 0 }
   0x4   :  { %18 = vsyncpa [#allocation4], 0  ;;  %s1166_s30 = smov [#allocation5]  }
   0x5   :  { %s35_s10 = sshll.u32 %s1166_s30, 4  ;;  %s36_s10 = int_to_ptr.vmem [resolvable:$true] %s35_s10 }
   0x6   :  { %s1024_s11 = scalar_lea.vmem %s36_s10, 128  ;;  %p1029_p1 = scmp.lt.s32.totalorder %s36_s10, %s36_s10 }
   0x7   :  { %p1025_p0 = scmp.ne.s32.totalorder %s36_s10, %s1024_s11  ;;  %p1030_p2 = scmp.lt.s32.totalorder %s1024_s11, %s1024_s11 }
   0x9   :  { %p1031_p3 = por %p1030_p2, %p1029_p1 }
   0xb   :  { %p1032_p4 = pnand %p1031_p3, %p1025_p0 }
   0xd   :  { %1035 = shalt.err (!%p1032_p4)
}
   0xe   :  { %38 = dma.hbm_to_vmem [thread:$0]  %s1405_s1, 128, %s36_s10, [#allocation6]  }
   0xf   :  { %s1167_s14 = smov [#allocation8]   ;;  %s1168_s16 = smov [#allocation2]  }
  0x10   :  { %s62_s15 = sshll.u32 %s1167_s14, 4  ;;  %s25_s17 = sshll.u32 %s1168_s16, 4  ;;  %s63_s15 = int_to_ptr.vmem [resolvable:$true] %s62_s15  ;;  %s26_s17 = int_to_ptr.vmem [resolvable:$true] %s25_s17 }
  0x11   :  { %s1044_s18 = scalar_lea.vmem %s63_s15, 512  ;;  %p1049_p6 = scmp.lt.s32.totalorder %s63_s15, %s63_s15 }
  0x12   :  { %p1045_p5 = scmp.ne.s32.totalorder %s63_s15, %s1044_s18  ;;  %p1050_p7 = scmp.lt.s32.totalorder %s1044_s18, %s1044_s18 }
  0x14   :  { %p1051_p8 = por %p1050_p7, %p1049_p6 }
  0x16   :  { %p1052_p9 = pnand %p1051_p8, %p1045_p5 }
  0x18   :  { %1055 = shalt.err (!%p1052_p9)
}
  0x19   :  { %s1169_s19 = smov 128   ;;  %s1170_s20 = smov 8  }
  0x1a   :  { %68 = dma.hbm_to_vmem [thread:$0]  %s1410_s6, 512, %s63_s15, [#allocation9], %s1169_s19, %s1169_s19, %s1170_s20  }
  0x1b   :  { %s1064_s1 = scalar_lea.vmem %s26_s17, 128  ;;  %p1069_p11 = scmp.lt.s32.totalorder %s26_s17, %s26_s17 }
  0x1c   :  { %p1065_p10 = scmp.ne.s32.totalorder %s26_s17, %s1064_s1  ;;  %p1070_p12 = scmp.lt.s32.totalorder %s1064_s1, %s1064_s1 }
  0x1e   :  { %p1071_p13 = por %p1070_p12, %p1069_p11 }
  0x20   :  { %p1072_p0 = pnand %p1071_p13, %p1065_p10 }
  0x22   :  { %1075 = shalt.err (!%p1072_p0)
}
  0x23   :  { %28 = dma.hbm_to_vmem [thread:$0]  %s1404_s0, 128, %s26_s17, [#allocation3]  }
  0x24   :  { %s1171_s25 = smov [#allocation7]   ;;  %s1172_s27 = smov [#allocation10]  }
  0x25   :  { %s44_s26 = sshll.u32 %s1171_s25, 4  ;;  %s74_s28 = sshll.u32 %s1172_s27, 4  ;;  %s45_s26 = int_to_ptr.vmem [resolvable:$true] %s44_s26  ;;  %s75_s28 = int_to_ptr.vmem [resolvable:$true] %s74_s28 }
  0x26   :  { %s1084_s29 = scalar_lea.vmem %s45_s26, 384  ;;  %p1089_p2 = scmp.lt.s32.totalorder %s45_s26, %s45_s26 }
  0x27   :  { %p1085_p1 = scmp.ne.s32.totalorder %s45_s26, %s1084_s29  ;;  %p1090_p3 = scmp.lt.s32.totalorder %s1084_s29, %s1084_s29 }
  0x29   :  { %p1091_p4 = por %p1090_p3, %p1089_p2 }
  0x2b   :  { %p1092_p5 = pnand %p1091_p4, %p1085_p1 }
  0x2d   :  { %1095 = shalt.err (!%p1092_p5)
}
  0x2e   :  { %50 = dma.hbm_to_vmem [thread:$0]  %s1406_s2, 384, %s45_s26, [#allocation6], %s1169_s19, %s1169_s19, %s1170_s20  }
  0x2f   :  { %s1104_s0 = scalar_lea.vmem %s75_s28, 512  ;;  %p1109_p7 = scmp.lt.s32.totalorder %s75_s28, %s75_s28 }
  0x30   :  { %p1105_p6 = scmp.ne.s32.totalorder %s75_s28, %s1104_s0  ;;  %p1110_p8 = scmp.lt.s32.totalorder %s1104_s0, %s1104_s0 }
  0x32   :  { %p1111_p9 = por %p1110_p8, %p1109_p7 }
  0x34   :  { %p1112_p10 = pnand %p1111_p9, %p1105_p6 }
  0x36   :  { %1115 = shalt.err (!%p1112_p10)
}
  0x37   :  { %80 = dma.hbm_to_vmem [thread:$0]  %s1411_s7, 512, %s75_s28, [#allocation9], %s1169_s19, %s1169_s19, %s1170_s20  }
  0x38   :  { %s1173_s12 = smov [#allocation11]  }
  0x39   :  { %s86_s13 = sshll.u32 %s1173_s12, 4  ;;  %s87_s13 = int_to_ptr.vmem [resolvable:$true] %s86_s13 }
  0x3a   :  { %s1124_s14 = scalar_lea.vmem %s87_s13, 256  ;;  %p1129_p12 = scmp.lt.s32.totalorder %s87_s13, %s87_s13 }
  0x3b   :  { %p1125_p11 = scmp.ne.s32.totalorder %s87_s13, %s1124_s14  ;;  %p1130_p13 = scmp.lt.s32.totalorder %s1124_s14, %s1124_s14 }
  0x3d   :  { %p1131_p0 = por %p1130_p13, %p1129_p12 }
  0x3f   :  { %p1132_p1 = pnand %p1131_p0, %p1125_p11 }
  0x41   :  { %1135 = shalt.err (!%p1132_p1)
}
  0x42   :  { %92 = dma.hbm_to_vmem [thread:$0]  %s1412_s8, 256, %s87_s13, [#allocation12], %s1169_s19, %s1169_s19, %s1170_s20  }
  0x43   :  { %1156 = dma.done.wait [#allocation3], 128  }
  0x44   :  { %1157 = vsyncadd [#allocation3], 4294967168 }
  0x45   :  { %1158 = dma.done.wait [#allocation6], 512  }
  0x46   :  { %1159 = vsyncadd [#allocation6], 4294966784 }
  0x47   :  { %1160 = dma.done.wait [#allocation9], 1024  }
  0x48   :  { %1161 = vsyncadd [#allocation9], 4294966272 }
  0x49   :  { %1162 = dma.done.wait [#allocation12], 256  }
  0x4a   :  { %1163 = vsyncadd [#allocation12], 4294967040  ;;  %v1174_v0 = vmov 0.0   ;;  %vm1175_vm0 = vmmov 0   ;;  %v117_v1 = vld [vmem:[#allocation7 + $0x10] sm:$0xff]  ;;  %v116_v2 = vld [vmem:[#allocation7 + $0x8] sm:$0xff]  ;;  %v118_v9 = vlaneseq }
  0x4b   :  { %925 = vmatprep.subr.mxu0 %v1174_v0  ;;  %931 = vmatprep.mubr.msk.f32.mxu0 %vm1175_vm0, %v1174_v0  ;;  %v115_v3 = vld [vmem:[#allocation7] sm:$0xff]  ;;  %v1269_v4 = vld [vmem:[#allocation2] sm:$0xff]  ;;  %vm122_vm1 = vcmask 195584   ;;  %v240_v5 = vld [vmem:[%s1407_s3 + $0x18] sm:$0xff]  ;;  %vm196_vm2 = vcmask 261120   ;;  %s1176_s29 = smov 120  }
  0x4c   :  { %934 = vmatprep.subr.mxu1 %v1174_v0  ;;  %942 = vmatprep.mubr.msk.f32.mxu1 %vm1175_vm0, %v1174_v0  ;;  %v239_v6 = vld [vmem:[%s1407_s3 + $0x10] sm:$0xff]  ;;  %v238_v7 = vld [vmem:[%s1407_s3 + $0x8] sm:$0xff]  ;;  %v237_v8 = vld [vmem:[%s1407_s3] sm:$0xff]  ;;  %v1293_v10 = vshrl.u32 %v118_v9, 7  ;;  %s1177_s6 = smov 112   ;;  %vm450_vm3 = vcmask 64512  }
  0x4d   :  { %926 = vmatpush3.msra.mxu0 %v117_v1  ;;  %935 = vmatpush3.msra.mxu1 %v240_v5  ;;  %v1296_v12 = vld [vmem:[#allocation11] sm:$0xff]  ;;  %v360_v50 = vld [vmem:[%s1408_s4 + $0x18] sm:$0xff]  ;;  %v359_v51 = vld [vmem:[%s1408_s4 + $0x10] sm:$0xff]  ;;  %s1178_s10 = smov 16   ;;  %s1180_s11 = smov 56   ;;  %vm864_vm4 = vcmask 130048  }
  0x4e   :  { %927 = vmatprep.subr.mxu0 %v1174_v0  ;;  %936 = vmatprep.subr.mxu1 %v1174_v0  ;;  %v120_v11 = vsub.s32 0, %v1293_v10  ;;  %v223_v40 = vsub.s32 1, %v1293_v10  ;;  %v233_v44 = vsub.s32 2, %v1293_v10  ;;  %v358_v52 = vld [vmem:[%s1408_s4 + $0x8] sm:$0xff]  ;;  %v357_v53 = vld [vmem:[%s1408_s4] sm:$0xff]  ;;  %v243_v54 = vsub.s32 3, %v1293_v10 }
  0x4f   :  { %928 = vmatpush3.msra.mxu0 %v116_v2  ;;  %937 = vmatpush3.msra.mxu1 %v239_v6  ;;  %vm867_vm5 = vcmask 457728   ;;  %s1181_s12 = smov [#allocation13]   ;;  %vm869_vm6 = vcmask 588800  }
  0x50   :  { %929 = vmatprep.subr.mxu0 %v1174_v0  ;;  %938 = vmatprep.subr.mxu1 %v1174_v0  ;;  %v121_v13 = vrot.slane %v1296_v12, %v120_v11  ;;  %v244_v55 = vrot.slane %v1296_v12, %v243_v54  ;;  %s878_s13 = sshll.u32 %s1181_s12, 4  ;;  %s879_s13 = int_to_ptr.vmem [resolvable:$true] %s878_s13 }
  0x51   :  { %930 = vmatpush3.msra.mxu0 %v115_v3  ;;  %939 = vmatpush3.msra.mxu1 %v238_v7  ;;  %s1136_s14 = scalar_lea.vmem %s879_s13, 128  ;;  %p1141_p3 = scmp.lt.s32.totalorder %s879_s13, %s879_s13 }
  0x52   :  { %932 = vmatmul.mubr.msk.f32.vlgmr.msra.gmra.mxu0 %vm122_vm1, %v1269_v4  ;;  %945 = vmatprep.subr.mxu0 %v1174_v0  ;;  %p1137_p2 = scmp.ne.s32.totalorder %s879_s13, %s1136_s14  ;;  %p1142_p4 = scmp.lt.s32.totalorder %s1136_s14, %s1136_s14 }
  0x53   :  { %953 = vmatprep.mubr.msk.f32.mxu0 %vm1175_vm0, %v1174_v0  ;;  %940 = vmatprep.subr.mxu1 %v1174_v0 }
  0x54   :  { %941 = vmatpush3.msra.mxu1 %v237_v8  ;;  %946 = vmatpush3.msra.mxu0 %v360_v50  ;;  %v641_v50 = vld [vmem:[#allocation8 + $0x8] sm:$0xff]  ;;  %p1143_p5 = por %p1142_p4, %p1141_p3 }
  0x55   :  { %956 = vmatprep.subr.mxu1 %v1174_v0  ;;  %947 = vmatprep.subr.mxu0 %v1174_v0 }
  0x56   :  { %948 = vmatpush3.msra.mxu0 %v359_v51  ;;  %v640_v51 = vld [vmem:[#allocation8] sm:$0xff]  ;;  %p1144_p6 = pnand %p1143_p5, %p1137_p2 }
  0x57   :  { %949 = vmatprep.subr.mxu0 %v1174_v0 }
  0x58   :  { %950 = vmatpush3.msra.mxu0 %v358_v52  ;;  %v598_v52 = vsub.s32 7, %v1293_v10 }
  0x59   :  { %951 = vmatprep.subr.mxu0 %v1174_v0 }
  0x5a   :  { %952 = vmatpush3.msra.mxu0 %v357_v53 }
  0x5b   :  { %966 = vmatprep.subr.mxu0 %v1174_v0 }
 0x112   :  { %v192_v14 = vpop.f32.mrf.mxu0 }
 0x113   :  { %v193_v15 = vadd.f32 %v192_v14, %v121_v13 }
 0x114   :  { %v933_v16 = vpop.f32.mrf.mxu0 }
 0x115   :  { %v197_v17 = vsel %vm196_vm2, %v193_v15, 0.0  ;;  %v206_v18 = vmul.f32 %v193_v15, %v193_v15 }
 0x116   :  { %v198_v19 = vrot.slane %v197_v17, 4 }
 0x117   :  { %v207_v20 = vsel %vm196_vm2, %v206_v18, 0.0 }
 0x118   :  { %v199_v21 = vadd.f32 %v198_v19, %v197_v17  ;;  %v208_v22 = vrot.slane %v207_v20, 4 }
 0x11a   :  { %v200_v23 = vrot.slane %v199_v21, 2  ;;  %v209_v24 = vadd.f32 %v208_v22, %v207_v20 }
 0x11c   :  { %v201_v25 = vadd.f32 %v200_v23, %v199_v21  ;;  %v210_v26 = vrot.slane %v209_v24, 2  ;;  %v343_v23 = vsub.s32 4, %v1293_v10 }
 0x11e   :  { %v202_v27 = vrot.slane %v201_v25, 1  ;;  %v211_v28 = vadd.f32 %v210_v26, %v209_v24 }
 0x120   :  { %v203_v29 = vadd.f32 %v202_v27, %v201_v25  ;;  %v212_v30 = vrot.slane %v211_v28, 1  ;;  %v353_v27 = vsub.s32 5, %v1293_v10 }
 0x122   :  { %v205_v31 = vmul.f32 0.125, %v203_v29  ;;  %v213_v32 = vadd.f32 %v212_v30, %v211_v28 }
 0x124   :  { %v214_v33 = vmul.f32 0.125, %v213_v32  ;;  %v215_v34 = vmul.f32 %v205_v31, %v205_v31 }
 0x126   :  { %v216_v35 = vsub.f32 %v214_v33, %v215_v34  ;;  %v363_v33 = vsub.s32 6, %v1293_v10 }
 0x128   :  { %v217_v36 = vmax.f32 %v216_v35, 0.0  ;;  %v364_v34 = vrot.slane %v1296_v12, %v363_v33 }
 0x12a   :  { %v218_v37 = vadd.f32 1e-05, %v217_v36 }
 0x12c   :  { %1004 = vrsqrt.f32 %v218_v37 }
 0x139   :  { %v1005_v38 = vpop.eup %1004 }
 0x13a   :  { %v220_v39 = vmul.f32 %v1005_v38, %v1296_v12 }
 0x13c   :  { %v226_v41 = vmul.f32 %v220_v39, %v205_v31  ;;  %v224_v42 = vrot.slane %v220_v39, %v223_v40  ;;  %v447_v39 = vld [vmem:[%s1409_s5 + $0x8] sm:$0xff] }
 0x13e   :  { %v228_v43 = vrot.slane %v226_v41, 7  ;;  %v225_v46 = vmul.f32 %v224_v42, %v193_v15  ;;  %v1358_v42 = vld [vmem:[#allocation5] sm:$0xff] }
 0x140   :  { %v230_v45 = vsub.f32 %v1296_v12, %v228_v43 }
 0x142   :  { %v234_v47 = vrot.slane %v230_v45, %v233_v44 }
 0x144   :  { %v235_v48 = vadd.f32 %v234_v47, %v225_v46  ;;  %v446_v47 = vld [vmem:[%s1409_s5] sm:$0xff]  ;;  %s1179_s5 = smov 24  }
 0x146   :  { %v236_v49 = vmax.f32 %v235_v48, 0.0 }
 0x148   :  { %943 = vmatmul.mubr.msk.f32.vlgmr.msra.gmra.mxu1 %vm196_vm2, %v236_v49  ;;  %v642_v49 = vld [vmem:[#allocation8 + $0x10] sm:$0xff] }
 0x149   :  { %958 = vmatprep.mubr.msk.f32.mxu1 %vm1175_vm0, %v1174_v0  ;;  %957 = vmatpush3.msra.mxu1 %v447_v39 }
 0x14a   :  { %961 = vmatprep.subr.mxu1 %v1174_v0 }
 0x208   :  { %v314_v56 = vpop.f32.mrf.mxu1 }
 0x209   :  { %v315_v57 = vadd.f32 %v314_v56, %v244_v55  ;;  %v599_v56 = vrot.slane %v1296_v12, %v598_v52 }
 0x20a   :  { %v944_v58 = vpop.f32.mrf.mxu1 }
 0x20b   :  { %v318_v59 = vsel %vm196_vm2, %v315_v57, 0.0  ;;  %v326_v60 = vmul.f32 %v315_v57, %v315_v57 }
 0x20c   :  { %v319_v61 = vrot.slane %v318_v59, 4 }
 0x20d   :  { %v327_v62 = vsel %vm196_vm2, %v326_v60, 0.0 }
 0x20e   :  { %v320_v63 = vadd.f32 %v319_v61, %v318_v59  ;;  %v328_v1 = vrot.slane %v327_v62, 4 }
 0x210   :  { %v321_v2 = vrot.slane %v320_v63, 2  ;;  %v329_v3 = vadd.f32 %v328_v1, %v327_v62 }
 0x212   :  { %v322_v5 = vadd.f32 %v321_v2, %v320_v63  ;;  %v330_v6 = vrot.slane %v329_v3, 2 }
 0x214   :  { %v323_v7 = vrot.slane %v322_v5, 1  ;;  %v331_v8 = vadd.f32 %v330_v6, %v329_v3 }
 0x216   :  { %v324_v9 = vadd.f32 %v323_v7, %v322_v5  ;;  %v332_v13 = vrot.slane %v331_v8, 1 }
 0x218   :  { %v325_v14 = vmul.f32 0.125, %v324_v9  ;;  %v333_v15 = vadd.f32 %v332_v13, %v331_v8 }
 0x21a   :  { %v334_v16 = vmul.f32 0.125, %v333_v15  ;;  %v335_v17 = vmul.f32 %v325_v14, %v325_v14 }
 0x21c   :  { %v336_v18 = vsub.f32 %v334_v16, %v335_v17 }
 0x21e   :  { %v337_v19 = vmax.f32 %v336_v18, 0.0 }
 0x220   :  { %v338_v20 = vadd.f32 1e-05, %v337_v19 }
 0x222   :  { %1006 = vrsqrt.f32 %v338_v20 }
 0x22f   :  { %v1007_v21 = vpop.eup %1006 }
 0x230   :  { %v340_v22 = vmul.f32 %v1007_v21, %v1296_v12 }
 0x232   :  { %v346_v24 = vmul.f32 %v340_v22, %v325_v14  ;;  %v344_v25 = vrot.slane %v340_v22, %v343_v23  ;;  %v114_v22 = vld [vmem:[#allocation11 + $0x8] sm:$0x3f] }
 0x234   :  { %v348_v26 = vrot.slane %v346_v24, 7  ;;  %v345_v29 = vmul.f32 %v344_v25, %v315_v57 }
 0x236   :  { %v350_v28 = vsub.f32 %v1296_v12, %v348_v26 }
 0x238   :  { %v354_v30 = vrot.slane %v350_v28, %v353_v27 }
 0x23a   :  { %v355_v31 = vadd.f32 %v354_v30, %v345_v29 }
 0x23c   :  { %v356_v32 = vmax.f32 %v355_v31, 0.0 }
 0x23e   :  { %954 = vmatmul.mubr.msk.f32.vlgmr.msra.gmra.mxu0 %vm196_vm2, %v356_v32 }
 0x23f   :  { %974 = vmatprep.mubr.msk.f32.mxu0 %vm1175_vm0, %v1174_v0 }
 0x2fe   :  { %v434_v35 = vpop.f32.mrf.mxu0 }
 0x2ff   :  { %v1349_v36 = vadd.f32 %v434_v35, %v364_v34  ;;  %v763_v35 = vld [vmem:[#allocation10 + $0x18] sm:$0xff] }
 0x300   :  { %v955_v37 = vpop.f32.mrf.mxu0 }
 0x301   :  { %v438_v38 = vmul.f32 1.442695, %v1349_v36  ;;  %v762_v37 = vld [vmem:[#allocation10 + $0x10] sm:$0xff] }
 0x303   :  { %1008 = vpow2.f32 %v438_v38  ;;  %v761_v38 = vld [vmem:[#allocation10 + $0x8] sm:$0xff] }
 0x310   :  { %v1009_v41 = vpop.eup %1008 }
 0x311   :  { %441 = vrot.lane.b32.xlu0 %v1009_v41, %s1176_s29 }
 0x315   :  { %448 = vrot.lane.b32.xlu0 %v1269_v4, %s1177_s6  ;;  %v643_v4 = vld [vmem:[#allocation8 + $0x18] sm:$0xff] }
 0x316   :  { %967 = vmatpush3.msra.mxu0 %v643_v4 }
 0x317   :  { %968 = vmatprep.subr.mxu0 %v1174_v0 }
 0x318   :  { %969 = vmatpush3.msra.mxu0 %v642_v49 }
 0x319   :  { %970 = vmatprep.subr.mxu0 %v1174_v0 }
 0x31a   :  { %971 = vmatpush3.msra.mxu0 %v641_v50 }
 0x31b   :  { %972 = vmatprep.subr.mxu0 %v1174_v0 }
 0x31c   :  { %973 = vmatpush3.msra.mxu0 %v640_v51 }
 0x383   :  { %v442_v43 = vpop.permute.xlu0 %441 }
 0x384   :  { %v444_v45 = vmul.f32 %v442_v43, %v1358_v42 }
 0x386   :  { %v445_v46 = vadd.f32 %v444_v45, %v1349_v36 }
 0x387   :  { %v449_v48 = vpop.permute.xlu0 %448 }
 0x388   :  { %853 = vrot.lane.b32.xlu0 %v445_v46, %s1178_s10  ;;  %959 = vmatmul.mubr.msk.f32.vlgmr.msra.gmra.mxu1 %vm450_vm3, %v449_v48 }
 0x389   :  { %962 = vmatpush3.msra.mxu1 %v446_v47  ;;  %963 = vmatprep.mubr.msk.f32.mxu1 %vm1175_vm0, %v1174_v0 }
 0x38a   :  { %977 = vmatprep.subr.mxu1 %v1174_v0 }
 0x38c   :  { %964 = vmatmul.mubr.msk.f32.vlgmr.msra.gmra.mxu1 %vm450_vm3, %v445_v46 }
 0x38d   :  { %985 = vmatprep.mubr.msk.f32.mxu1 %vm1175_vm0, %v1174_v0  ;;  %978 = vmatpush3.msra.mxu1 %v763_v35 }
 0x38e   :  { %979 = vmatprep.subr.mxu1 %v1174_v0 }
 0x38f   :  { %980 = vmatpush3.msra.mxu1 %v762_v37 }
 0x390   :  { %981 = vmatprep.subr.mxu1 %v1174_v0 }
 0x391   :  { %982 = vmatpush3.msra.mxu1 %v761_v38 }
 0x392   :  { %983 = vmatprep.subr.mxu1 %v1174_v0 }
 0x3fa   :  { %v854_v10 = vpop.permute.xlu0 %853 }
 0x448   :  { %v519_v53 = vpop.f32.mrf.mxu1 }
 0x44a   :  { %v960_v55 = vpop.f32.mrf.mxu1 }
 0x44c   :  { %v592_v57 = vpop.f32.mrf.mxu1 }
 0x44d   :  { %v593_v58 = vadd.f32 %v592_v57, %v519_v53 }
 0x44e   :  { %v965_v59 = vpop.f32.mrf.mxu1 }
 0x44f   :  { %v600_v60 = vadd.f32 %v599_v56, %v593_v58 }
 0x451   :  { %v601_v61 = vsel %vm196_vm2, %v600_v60, 0.0  ;;  %v609_v62 = vmul.f32 %v600_v60, %v600_v60 }
 0x452   :  { %v602_v63 = vrot.slane %v601_v61, 4 }
 0x453   :  { %v610_v1 = vsel %vm196_vm2, %v609_v62, 0.0 }
 0x454   :  { %v603_v2 = vadd.f32 %v602_v63, %v601_v61  ;;  %v611_v3 = vrot.slane %v610_v1, 4 }
 0x456   :  { %v604_v5 = vrot.slane %v603_v2, 2  ;;  %v612_v6 = vadd.f32 %v611_v3, %v610_v1 }
 0x458   :  { %v605_v7 = vadd.f32 %v604_v5, %v603_v2  ;;  %v613_v8 = vrot.slane %v612_v6, 2 }
 0x45a   :  { %v606_v9 = vrot.slane %v605_v7, 1  ;;  %v614_v13 = vadd.f32 %v613_v8, %v612_v6 }
 0x45c   :  { %v607_v14 = vadd.f32 %v606_v9, %v605_v7  ;;  %v615_v12 = vrot.slane %v614_v13, 1 }
 0x45e   :  { %v608_v15 = vmul.f32 0.125, %v607_v14  ;;  %v616_v16 = vadd.f32 %v615_v12, %v614_v13  ;;  %v767_v12 = vrot.slane %v114_v22, %v353_v27 }
 0x460   :  { %v617_v17 = vmul.f32 0.125, %v616_v16  ;;  %v618_v18 = vmul.f32 %v608_v15, %v608_v15 }
 0x462   :  { %v619_v19 = vsub.f32 %v617_v17, %v618_v18 }
 0x464   :  { %v620_v20 = vmax.f32 %v619_v19, 0.0 }
 0x466   :  { %v621_v21 = vadd.f32 1e-05, %v620_v20 }
 0x468   :  { %1010 = vrsqrt.f32 %v621_v21 }
 0x475   :  { %v1011_v24 = vpop.eup %1010 }
 0x476   :  { %v623_v25 = vmul.f32 %v1011_v24, %v114_v22 }
 0x478   :  { %v629_v26 = vmul.f32 %v623_v25, %v608_v15  ;;  %v627_v28 = vrot.slane %v623_v25, %v120_v11  ;;  %v760_v11 = vld [vmem:[#allocation10] sm:$0xff] }
 0x479   :  { %984 = vmatpush3.msra.mxu1 %v760_v11 }
 0x47a   :  { %v631_v29 = vrot.slane %v629_v26, 7  ;;  %v628_v31 = vmul.f32 %v627_v28, %v600_v60 }
 0x47c   :  { %v633_v30 = vsub.f32 %v114_v22, %v631_v29 }
 0x47e   :  { %v637_v32 = vrot.slane %v633_v30, %v223_v40  ;;  %v647_v40 = vrot.slane %v114_v22, %v233_v44 }
 0x480   :  { %v638_v33 = vadd.f32 %v637_v32, %v628_v31 }
 0x482   :  { %v639_v34 = vmax.f32 %v638_v33, 0.0 }
 0x484   :  { %975 = vmatmul.mubr.msk.f32.vlgmr.msra.gmra.mxu0 %vm196_vm2, %v639_v34 }
 0x544   :  { %v717_v39 = vpop.f32.mrf.mxu0 }
 0x545   :  { %v718_v41 = vadd.f32 %v717_v39, %v647_v40 }
 0x546   :  { %v976_v43 = vpop.f32.mrf.mxu0 }
 0x547   :  { %v721_v45 = vsel %vm196_vm2, %v718_v41, 0.0  ;;  %v729_v46 = vmul.f32 %v718_v41, %v718_v41 }
 0x548   :  { %v722_v47 = vrot.slane %v721_v45, 4 }
 0x549   :  { %v730_v48 = vsel %vm196_vm2, %v729_v46, 0.0 }
 0x54a   :  { %v723_v4 = vadd.f32 %v722_v47, %v721_v45  ;;  %v731_v49 = vrot.slane %v730_v48, 4 }
 0x54c   :  { %v724_v50 = vrot.slane %v723_v4, 2  ;;  %v732_v51 = vadd.f32 %v731_v49, %v730_v48 }
 0x54e   :  { %v725_v52 = vadd.f32 %v724_v50, %v723_v4  ;;  %v733_v0 = vrot.slane %v732_v51, 2 }
 0x550   :  { %v726_v53 = vrot.slane %v725_v52, 1  ;;  %v734_v55 = vadd.f32 %v733_v0, %v732_v51 }
 0x552   :  { %v727_v56 = vadd.f32 %v726_v53, %v725_v52  ;;  %v735_v57 = vrot.slane %v734_v55, 1 }
 0x554   :  { %v728_v44 = vmul.f32 0.125, %v727_v56  ;;  %v736_v58 = vadd.f32 %v735_v57, %v734_v55 }
 0x556   :  { %v737_v59 = vmul.f32 0.125, %v736_v58  ;;  %v738_v60 = vmul.f32 %v728_v44, %v728_v44 }
 0x558   :  { %v739_v61 = vsub.f32 %v737_v59, %v738_v60 }
 0x55a   :  { %v740_v62 = vmax.f32 %v739_v61, 0.0 }
 0x55c   :  { %v741_v63 = vadd.f32 1e-05, %v740_v62 }
 0x55e   :  { %1012 = vrsqrt.f32 %v741_v63 }
 0x56b   :  { %v1013_v1 = vpop.eup %1012 }
 0x56c   :  { %v743_v2 = vmul.f32 %v1013_v1, %v114_v22 }
 0x56e   :  { %v749_v3 = vmul.f32 %v743_v2, %v728_v44  ;;  %v747_v5 = vrot.slane %v743_v2, %v243_v54 }
 0x570   :  { %v751_v6 = vrot.slane %v749_v3, 7  ;;  %v748_v8 = vmul.f32 %v747_v5, %v718_v41 }
 0x572   :  { %v753_v7 = vsub.f32 %v114_v22, %v751_v6  ;;  %v865_v22 = vsel %vm864_vm4, %v1349_v36, %v854_v10 }
 0x574   :  { %v757_v9 = vrot.slane %v753_v7, %v343_v23 }
 0x576   :  { %v758_v13 = vadd.f32 %v757_v9, %v748_v8 }
 0x578   :  { %v759_v14 = vmax.f32 %v758_v13, 0.0 }
 0x57a   :  { %986 = vmatmul.mubr.msk.f32.vlgmr.msra.gmra.mxu1 %vm196_vm2, %v759_v14 }
 0x63a   :  { %v837_v15 = vpop.f32.mrf.mxu1 }
 0x63b   :  { %v838_v16 = vadd.f32 %v837_v15, %v767_v12 }
 0x63c   :  { %v987_v17 = vpop.f32.mrf.mxu1 }
 0x63d   :  { %v841_v18 = vmul.f32 1.442695, %v838_v16 }
 0x63f   :  { %1014 = vpow2.f32 %v841_v18 }
 0x64c   :  { %v1015_v19 = vpop.eup %1014 }
 0x64d   :  { %844 = vrot.lane.b32.xlu1 %v1015_v19, %s1176_s29 }
 0x6bf   :  { %v845_v54 = vpop.permute.xlu1 %844 }
 0x6c0   :  { %v847_v20 = vmul.f32 %v845_v54, %v1358_v42 }
 0x6c2   :  { %849 = vrot.lane.b32.xlu1 %v847_v20, %s1176_s29 }
 0x6c6   :  { %857 = vrot.lane.b32.xlu1 %v838_v16, %s1179_s5 }
 0x734   :  { %v850_v23 = vpop.permute.xlu1 %849 }
 0x735   :  { %v852_v21 = vadd.f32 %v850_v23, %v838_v16 }
 0x737   :  { %861 = vrot.lane.b32.xlu0 %v852_v21, %s1180_s11 }
 0x738   :  { %v858_v27 = vpop.permute.xlu1 %857 }
 0x739   :  { %v866_v24 = vsel %vm122_vm1, %v865_v22, %v858_v27 }
 0x7a9   :  { %v862_v42 = vpop.permute.xlu0 %861 }
 0x7aa   :  { %v868_v25 = vsel %vm867_vm5, %v866_v24, %v862_v42 }
 0x7ab   :  { %v870_v26 = vsel %vm869_vm6, %v868_v25, 0.0 }
 0x7ac   :  { %871 = vst [vmem:[#allocation13] sm:$0xff] %v870_v26 }
 0x7ad   :  { %1147 = shalt.err (!%p1144_p6)
}
 0x7ae   :  { %881 = dma.vmem_to_hbm [thread:$0]  %s879_s13, 128, %s1413_s9, [#allocation4]  }
 0x7af   :  { %1164 = dma.done.wait [#allocation4], 128  }
 0x7b0   :  { %1165 = vsyncadd [#allocation4], 4294967168 }
 0x7b1   :  { %885 = vsyncpa [#allocation3], 1 }
 0x7b2   :  { %886 = vsyncpa [#allocation6], 1 }
 0x7b3   :  { %887 = vsyncpa [#allocation9], 1 }
 0x7b4   :  { %888 = vsyncpa [#allocation12], 1 }
 0x7b5   :  { %889 = vsyncpa [#allocation4], 1 }

</bundles_post_ra>
